<compile_context>
chip_gen: v5e
topology: v5e:2x2
jax: 0.10.0
libtpu: 0.0.40
codegen_flags: <defaults>
</compile_context>

<pallas_src>
import jax
import jax.numpy as jnp
from jax.experimental import pallas as pl
from jax.experimental.pallas import tpu as pltpu

POOL_K = 5
POOL_S = 3
BN_EPS = 1e-5
LANES = 128


def _round_up(x, m):
    return ((x + m - 1) // m) * m


def _inception_aux_kernel(x_ref, w_head_ref, bn_bias_ref, w1_ref, b1_ref,
                          w2_ref, b2_ref, o_ref):
    """Fused aux classifier for one batch tile.

    x_ref:       [Nt, 25*C]   bf16   (5x5 pool window, flattened (h, w, c))
    w_head_ref:  [25*C, 128]  bf16   (tile(conv_w * bn_scale, (25,1)) / 25)
    bn_bias_ref: [1, 128]     f32    (beta - running_mean * bn_scale)
    w1_ref:      [128, 1024]  bf16
    b1_ref:      [1, 1024]    f32
    w2_ref:      [1024, NCp]  bf16   (num_classes padded to 128 lanes)
    b2_ref:      [1, NCp]     f32
    o_ref:       [Nt, NCp]    f32
    """
    # AvgPool(5,3) + 1x1 conv + BN(eval) scale, all folded into one MXU matmul.
    feat = jnp.dot(x_ref[...], w_head_ref[...], preferred_element_type=jnp.float32)
    feat = jnp.maximum(feat + bn_bias_ref[...], 0.0)          # BN bias + ReLU -> [Nt,128]

    # dropout(p=0.7) is identity in eval mode.
    h = jnp.dot(feat.astype(w1_ref.dtype), w1_ref[...],
                preferred_element_type=jnp.float32) + b1_ref[...]
    h = jnp.maximum(h, 0.0)                                   # ReLU -> [Nt,1024]

    o_ref[...] = jnp.dot(h.astype(w2_ref.dtype), w2_ref[...],
                         preferred_element_type=jnp.float32) + b2_ref[...]


def init_params(key, in_channels, num_classes):
    """PyTorch-style eval-mode parameters (f32)."""
    ks = jax.random.split(key, 9)
    return {
        "conv_w": jax.random.normal(ks[0], (in_channels, 128), jnp.float32) * 0.1,
        "gamma": 1.0 + 0.1 * jax.random.normal(ks[1], (128,), jnp.float32),
        "beta": 0.1 * jax.random.normal(ks[2], (128,), jnp.float32),
        "run_mean": 0.1 * jax.random.normal(ks[3], (128,), jnp.float32),
        "run_var": jax.random.uniform(ks[4], (128,), jnp.float32, minval=0.5, maxval=1.5),
        "fc1_w": jax.random.normal(ks[5], (128, 1024), jnp.float32) * 0.05,
        "fc1_b": jax.random.normal(ks[6], (1024,), jnp.float32) * 0.05,
        "fc2_w": jax.random.normal(ks[7], (1024, num_classes), jnp.float32) * 0.05,
        "fc2_b": jax.random.normal(ks[8], (num_classes,), jnp.float32) * 0.05,
    }


def fold_params_for_inference(params):
    """One-time fold: AvgPool(1/25) + BN scale into the conv weight; pad classes to 128."""
    num_classes = params["fc2_w"].shape[1]
    nc_pad = _round_up(num_classes, LANES)

    bn_scale = params["gamma"] / jnp.sqrt(params["run_var"] + BN_EPS)      # [128]
    bn_bias = params["beta"] - params["run_mean"] * bn_scale               # [128]

    conv_scaled = params["conv_w"] * bn_scale[None, :]                     # [C,128]
    w_head = jnp.tile(conv_scaled, (POOL_K * POOL_K, 1)) / float(POOL_K * POOL_K)

    fc2_w = jnp.pad(params["fc2_w"], ((0, 0), (0, nc_pad - num_classes)))
    fc2_b = jnp.pad(params["fc2_b"], ((0, nc_pad - num_classes),))

    return {
        "w_head": w_head.astype(jnp.bfloat16),                 # [25*C, 128]
        "bn_bias": bn_bias.reshape(1, 128).astype(jnp.float32),
        "fc1_w": params["fc1_w"].astype(jnp.bfloat16),
        "fc1_b": params["fc1_b"].reshape(1, 1024).astype(jnp.float32),
        "fc2_w": fc2_w.astype(jnp.bfloat16),                   # [1024, nc_pad]
        "fc2_b": fc2_b.reshape(1, nc_pad).astype(jnp.float32),
    }


def inception_aux_forward(x_nchw, fp, *, num_classes):
    n, c, h, w = x_nchw.shape
    hp = (h - POOL_K) // POOL_S + 1
    wp = (w - POOL_K) // POOL_S + 1
    # nn.Linear(128, 1024) after flatten requires 128 * hp * wp == 128.
    assert hp == 1 and wp == 1, "fc1 expects 128 flattened features (pooled spatial must be 1x1)"

    k_head = POOL_K * POOL_K * c
    nc_pad = fp["fc2_w"].shape[1]

    # Slice the single 5x5 pooling window BEFORE the layout transpose (moves 25*C bytes/img).
    x_win = jnp.transpose(x_nchw[:, :, :POOL_K, :POOL_K], (0, 2, 3, 1))    # [N,5,5,C]
    x2d = x_win.reshape(n, k_head).astype(jnp.bfloat16)                    # [N, 25*C]

    # Batch tile: multiple of 8 sublanes; cap so the double-buffered bf16 input
    # tile stays well under the v7x 64 MiB VMEM.
    n_tile = min(256, _round_up(n, 8))
    max_tile = max(8, (((8 * 1024 * 1024) // (k_head * 2)) // 8) * 8)
    n_tile = min(n_tile, max_tile)
    n_pad = _round_up(n, n_tile)
    if n_pad != n:
        x2d = jnp.pad(x2d, ((0, n_pad - n), (0, 0)))

    logits = pl.pallas_call(
        _inception_aux_kernel,
        out_shape=jax.ShapeDtypeStruct((n_pad, nc_pad), jnp.float32),
        grid=(n_pad // n_tile,),
        in_specs=[
            pl.BlockSpec((n_tile, k_head), lambda i: (i, 0)),      # x tile (pipelined)
            pl.BlockSpec((k_head, 128), lambda i: (0, 0)),         # resident weights
            pl.BlockSpec((1, 128), lambda i: (0, 0)),
            pl.BlockSpec((128, 1024), lambda i: (0, 0)),
            pl.BlockSpec((1, 1024), lambda i: (0, 0)),
            pl.BlockSpec((1024, nc_pad), lambda i: (0, 0)),
            pl.BlockSpec((1, nc_pad), lambda i: (0, 0)),
        ],
        out_specs=pl.BlockSpec((n_tile, nc_pad), lambda i: (i, 0)),
        compiler_params=pltpu.CompilerParams(
            dimension_semantics=("parallel",),
            vmem_limit_bytes=48 * 1024 * 1024,
        ),
    )(x2d, fp["w_head"], fp["bn_bias"], fp["fc1_w"], fp["fc1_b"],
      fp["fc2_w"], fp["fc2_b"])

    return logits[:n, :num_classes]


def _reference_forward(x_nchw, params):
    """Pure-JAX f32 reference (eval-mode semantics) for a correctness check."""
    win = x_nchw[:, :, :POOL_K, :POOL_K].astype(jnp.float32)
    pooled = jnp.mean(win, axis=(2, 3))                                    # [N, C]
    y = pooled @ params["conv_w"]                                          # [N, 128]
    scale = params["gamma"] / jnp.sqrt(params["run_var"] + BN_EPS)
    y = jnp.maximum(y * scale + (params["beta"] - params["run_mean"] * scale), 0.0)
    h = jnp.maximum(y @ params["fc1_w"] + params["fc1_b"], 0.0)
    return h @ params["fc2_w"] + params["fc2_b"]


if __name__ == "__main__":
    key = jax.random.PRNGKey(0)
    k_x, k_p = jax.random.split(key)

    batch, in_channels, spatial, num_classes = 2, 4, 7, 10   # 7x7 -> AvgPool(5,3) -> 1x1
    x = jax.random.normal(k_x, (batch, in_channels, spatial, spatial), jnp.float32)
    params = init_params(k_p, in_channels, num_classes)
    folded = fold_params_for_inference(params)

    fwd = jax.jit(inception_aux_forward, static_argnames=("num_classes",))
    out = fwd(x, folded, num_classes=num_classes)
    out = jax.block_until_ready(out)

    assert out.shape == (batch, num_classes)
    assert bool(jnp.all(jnp.isfinite(out)))

    ref = _reference_forward(x, params)
    assert bool(jnp.allclose(out, ref, rtol=5e-2, atol=5e-2)), "mismatch vs f32 reference"

    print("KERNEL_OK")
</pallas_src>

<mosaic_0001>
module attributes {stable_mosaic.version = 11 : i64} {
  func.func @_inception_aux_kernel(%arg0: i32, %arg1: memref<8x100xbf16, #tpu.memory_space<vmem>>, %arg2: memref<100x128xbf16, #tpu.memory_space<vmem>>, %arg3: memref<1x128xf32, #tpu.memory_space<vmem>>, %arg4: memref<128x1024xbf16, #tpu.memory_space<vmem>>, %arg5: memref<1x1024xf32, #tpu.memory_space<vmem>>, %arg6: memref<1024x128xbf16, #tpu.memory_space<vmem>>, %arg7: memref<1x128xf32, #tpu.memory_space<vmem>>, %arg8: memref<8x128xf32, #tpu.memory_space<vmem>>) attributes {dimension_semantics = [#tpu.dimension_semantics<parallel>], iteration_bounds = array<i64: 1>, scalar_prefetch = 0 : i64, scratch_operands = 0 : i64, tpu.core_type = #tpu.core_type<tc>, window_params = [{transform_indices = @transform_0, window_bounds = array<i64: 8, 100>}, {pipeline_mode = #tpu.pipeline_mode<synchronous>, transform_indices = @transform_1, window_bounds = array<i64: 100, 128>}, {pipeline_mode = #tpu.pipeline_mode<synchronous>, transform_indices = @transform_2, window_bounds = array<i64: 1, 128>}, {pipeline_mode = #tpu.pipeline_mode<synchronous>, transform_indices = @transform_3, window_bounds = array<i64: 128, 1024>}, {pipeline_mode = #tpu.pipeline_mode<synchronous>, transform_indices = @transform_4, window_bounds = array<i64: 1, 1024>}, {pipeline_mode = #tpu.pipeline_mode<synchronous>, transform_indices = @transform_5, window_bounds = array<i64: 1024, 128>}, {pipeline_mode = #tpu.pipeline_mode<synchronous>, transform_indices = @transform_6, window_bounds = array<i64: 1, 128>}, {transform_indices = @transform_7, window_bounds = array<i64: 8, 128>}]} {
    %c0 = arith.constant 0 : index
    %c0_0 = arith.constant 0 : index
    %0 = vector.load %arg1[%c0, %c0_0] : memref<8x100xbf16, #tpu.memory_space<vmem>>, vector<8x100xbf16>
    %c0_1 = arith.constant 0 : index
    %c0_2 = arith.constant 0 : index
    %1 = vector.load %arg2[%c0_1, %c0_2] : memref<100x128xbf16, #tpu.memory_space<vmem>>, vector<100x128xbf16>
    %cst = arith.constant dense<0.000000e+00> : vector<8x128xf32>
    %2 = tpu.matmul %0, %1, %cst {dimension_numbers = #tpu.dot_dimension_numbers<[1], [0], [0], [1], [0, 0, 1, 1], [], []>} : vector<8x100xbf16>, vector<100x128xbf16>, vector<8x128xf32> -> vector<8x128xf32>
    %c0_3 = arith.constant 0 : index
    %c0_4 = arith.constant 0 : index
    %3 = vector.load %arg3[%c0_3, %c0_4] : memref<1x128xf32, #tpu.memory_space<vmem>>, vector<1x128xf32>
    %4 = vector.broadcast %3 : vector<1x128xf32> to vector<8x128xf32>
    %5 = arith.addf %2, %4 : vector<8x128xf32>
    %cst_5 = arith.constant 0.000000e+00 : f32
    %6 = vector.broadcast %cst_5 : f32 to vector<8x128xf32>
    %7 = arith.maximumf %5, %6 : vector<8x128xf32>
    %8 = arith.truncf %7 : vector<8x128xf32> to vector<8x128xbf16>
    %c0_6 = arith.constant 0 : index
    %c0_7 = arith.constant 0 : index
    %9 = vector.load %arg4[%c0_6, %c0_7] : memref<128x1024xbf16, #tpu.memory_space<vmem>>, vector<128x1024xbf16>
    %cst_8 = arith.constant dense<0.000000e+00> : vector<8x1024xf32>
    %10 = tpu.matmul %8, %9, %cst_8 {dimension_numbers = #tpu.dot_dimension_numbers<[1], [0], [0], [1], [0, 0, 1, 1], [], []>} : vector<8x128xbf16>, vector<128x1024xbf16>, vector<8x1024xf32> -> vector<8x1024xf32>
    %c0_9 = arith.constant 0 : index
    %c0_10 = arith.constant 0 : index
    %11 = vector.load %arg5[%c0_9, %c0_10] : memref<1x1024xf32, #tpu.memory_space<vmem>>, vector<1x1024xf32>
    %12 = vector.broadcast %11 : vector<1x1024xf32> to vector<8x1024xf32>
    %13 = arith.addf %10, %12 : vector<8x1024xf32>
    %cst_11 = arith.constant 0.000000e+00 : f32
    %14 = vector.broadcast %cst_11 : f32 to vector<8x1024xf32>
    %15 = arith.maximumf %13, %14 : vector<8x1024xf32>
    %16 = arith.truncf %15 : vector<8x1024xf32> to vector<8x1024xbf16>
    %c0_12 = arith.constant 0 : index
    %c0_13 = arith.constant 0 : index
    %17 = vector.load %arg6[%c0_12, %c0_13] : memref<1024x128xbf16, #tpu.memory_space<vmem>>, vector<1024x128xbf16>
    %cst_14 = arith.constant dense<0.000000e+00> : vector<8x128xf32>
    %18 = tpu.matmul %16, %17, %cst_14 {dimension_numbers = #tpu.dot_dimension_numbers<[1], [0], [0], [1], [0, 0, 1, 1], [], []>} : vector<8x1024xbf16>, vector<1024x128xbf16>, vector<8x128xf32> -> vector<8x128xf32>
    %c0_15 = arith.constant 0 : index
    %c0_16 = arith.constant 0 : index
    %19 = vector.load %arg7[%c0_15, %c0_16] : memref<1x128xf32, #tpu.memory_space<vmem>>, vector<1x128xf32>
    %20 = vector.broadcast %19 : vector<1x128xf32> to vector<8x128xf32>
    %21 = arith.addf %18, %20 : vector<8x128xf32>
    %c0_17 = arith.constant 0 : index
    %c0_18 = arith.constant 0 : index
    %22 = vector.load %arg8[%c0_17, %c0_18] : memref<8x128xf32, #tpu.memory_space<vmem>>, vector<8x128xf32>
    tpu.vector_store %arg8[%c0_17, %c0_18], %21 {strides = array<i32>} : memref<8x128xf32, #tpu.memory_space<vmem>>, vector<8x128xf32>,
    return
  }
  func.func @transform_0(%arg0: i32) -> (i32, i32) {
    %c0_i32 = arith.constant 0 : i32
    %c0_i32_0 = arith.constant 0 : i32
    return %arg0, %c0_i32 : i32, i32
  }
  func.func @transform_1(%arg0: i32) -> (i32, i32) {
    %c0_i32 = arith.constant 0 : i32
    %c0_i32_0 = arith.constant 0 : i32
    %c0_i32_1 = arith.constant 0 : i32
    return %c0_i32, %c0_i32_0 : i32, i32
  }
  func.func @transform_2(%arg0: i32) -> (i32, i32) {
    %c0_i32 = arith.constant 0 : i32
    %c0_i32_0 = arith.constant 0 : i32
    %c0_i32_1 = arith.constant 0 : i32
    return %c0_i32, %c0_i32_0 : i32, i32
  }
  func.func @transform_3(%arg0: i32) -> (i32, i32) {
    %c0_i32 = arith.constant 0 : i32
    %c0_i32_0 = arith.constant 0 : i32
    %c0_i32_1 = arith.constant 0 : i32
    return %c0_i32, %c0_i32_0 : i32, i32
  }
  func.func @transform_4(%arg0: i32) -> (i32, i32) {
    %c0_i32 = arith.constant 0 : i32
    %c0_i32_0 = arith.constant 0 : i32
    %c0_i32_1 = arith.constant 0 : i32
    return %c0_i32, %c0_i32_0 : i32, i32
  }
  func.func @transform_5(%arg0: i32) -> (i32, i32) {
    %c0_i32 = arith.constant 0 : i32
    %c0_i32_0 = arith.constant 0 : i32
    %c0_i32_1 = arith.constant 0 : i32
    return %c0_i32, %c0_i32_0 : i32, i32
  }
  func.func @transform_6(%arg0: i32) -> (i32, i32) {
    %c0_i32 = arith.constant 0 : i32
    %c0_i32_0 = arith.constant 0 : i32
    %c0_i32_1 = arith.constant 0 : i32
    return %c0_i32, %c0_i32_0 : i32, i32
  }
  func.func @transform_7(%arg0: i32) -> (i32, i32) {
    %c0_i32 = arith.constant 0 : i32
    %c0_i32_0 = arith.constant 0 : i32
    return %arg0, %c0_i32 : i32, i32
  }
}

</mosaic_0001>

<bundles_post_ra>
// kernel: inception_aux_forward.1
= control target key start
LH: loop header
LB: loop body
LE: loop exit
PB: predicated region body
PF: predicated region fallthrough
CT: control target
= control target key end

     0   :  { %12 = vsyncpa [#allocation3], 0  ;;  %s2108_s0 = inlined_call_operand.vmem [shape: bf16[8,100], index: 0, kind: input, shape index: {}]   ;;  %s2109_s1 = inlined_call_operand.vmem [shape: bf16[100,128], index: 1, kind: input, shape index: {}]   ;;  %s2110_s2 = inlined_call_operand.vmem [shape: f32[1,128], index: 2, kind: input, shape index: {}]   ;;  %s2111_s3 = inlined_call_operand.hbm [shape: bf16[128,1024], index: 3, kind: input, shape index: {}]   ;;  %s2112_s4 = inlined_call_operand.vmem [shape: f32[1,1024], index: 4, kind: input, shape index: {}]   ;;  %s2113_s5 = inlined_call_operand.hbm [shape: bf16[1024,128], index: 5, kind: input, shape index: {}]   ;;  %s2114_s6 = inlined_call_operand.vmem [shape: f32[1,128], index: 6, kind: input, shape index: {}]   ;;  %s2115_s7 = inlined_call_operand.vmem [shape: f32[8,128], index: 7, kind: output, shape index: {}]  }
   0x1   :  { %s24_s26 = sshll.u32 %s2111_s3, 4  ;;  %s25_s26 = int_to_ptr.hbm [resolvable:$true] %s24_s26 }
   0x2   :  { %13 = vsyncpa [#allocation5], 0  ;;  %s2019_s27 = smov [#allocation2]   ;;  %s39_s8 = sshll.u32 %s2113_s5, 4  ;;  %s40_s8 = int_to_ptr.hbm [resolvable:$true] %s39_s8 }
   0x3   :  { %s26_s28 = sshll.u32 %s2019_s27, 4  ;;  %s2020_s9 = smov 512   ;;  %s27_s28 = int_to_ptr.vmem [resolvable:$true] %s26_s28 }
   0x4   :  { %s2021_s10 = smov 32   ;;  %s2022_s11 = smov [#allocation4]  }
   0x5   :  { %32 = dma.hbm_to_vmem [thread:$0]  %s25_s26, 8192, %s27_s28, [#allocation3], %s2020_s9, %s2020_s9, %s2021_s10  }
   0x6   :  { %s41_s12 = sshll.u32 %s2022_s11, 4  ;;  %s2023_s13 = smov 64   ;;  %s42_s12 = int_to_ptr.vmem [resolvable:$true] %s41_s12 }
   0x7   :  { %s2024_s14 = smov 4  }
   0x8   :  { %47 = dma.hbm_to_vmem [thread:$0]  %s40_s8, 8192, %s42_s12, [#allocation5], %s2023_s13, %s2023_s13, %s2024_s14  }
   0x9   :  { %2015 = dma.done.wait [#allocation3], 8192  }
   0xa   :  { %2016 = vsyncadd [#allocation3], 4294959104 }
   0xb   :  { %2017 = dma.done.wait [#allocation5], 8192  }
   0xc   :  { %2018 = vsyncadd [#allocation5], 4294959104  ;;  %v72_v0 = vld [vmem:[%s2109_s1 + $0x30] sm:$0x3]  ;;  %vm120_vm0 = vcmask 1041408   ;;  %v1830_v12 = vld [vmem:[%s2109_s1 + $0x28] sm:$0xff] }
   0xd   :  { %v102_v1 = vunpack.c.l.b16 %v72_v0  ;;  %v1539_v2 = vld [vmem:[#allocation2 + $0x1c0] sm:$0xf]  ;;  %v1887_v5 = vld [vmem:[#allocation2 + $0x1c4] sm:$0xf]  ;;  %v1547_v9 = vld [vmem:[#allocation2 + $0x1c8] sm:$0xf] }
   0xe   :  { %v1891_v4 = vld [vmem:[#allocation2 + $0x1dc] sm:$0xf0]  ;;  %v1541_v6 = vld [vmem:[#allocation2 + $0x1e0] sm:$0xf0]  ;;  %v1892_v10 = vld [vmem:[#allocation2 + $0x1e4] sm:$0xf0] }
   0xf   :  { %v109_v3 = vpack.c.b16 %v102_v1, %v102_v1  ;;  %v1540_v7 = vor.u32 %v1891_v4, %v1539_v2  ;;  %v1544_v8 = vor.u32 %v1887_v5, %v1541_v6  ;;  %v1548_v13 = vor.u32 %v1892_v10, %v1547_v9  ;;  %v1507_v14 = vld [vmem:[#allocation2 + $0x180] sm:$0xf]  ;;  %v1879_v16 = vld [vmem:[#allocation2 + $0x184] sm:$0xf]  ;;  %v1515_v20 = vld [vmem:[#allocation2 + $0x188] sm:$0xf] }
  0x10   :  { %v1883_v15 = vld [vmem:[#allocation2 + $0x19c] sm:$0xf0]  ;;  %v1509_v17 = vld [vmem:[#allocation2 + $0x1a0] sm:$0xf0]  ;;  %v1884_v21 = vld [vmem:[#allocation2 + $0x1a4] sm:$0xf0] }
  0x11   :  { %v122_v11 = vsel %vm120_vm0, %v109_v3, 0  ;;  %541 = vmatpush.bf16.msra.mxu1 %v1540_v7  ;;  %554 = vmatpush.bf16.msra.mxu2 %v1544_v8  ;;  %v1508_v18 = vor.u32 %v1883_v15, %v1507_v14  ;;  %v1512_v19 = vor.u32 %v1879_v16, %v1509_v17  ;;  %v1516_v22 = vor.u32 %v1884_v21, %v1515_v20  ;;  %v1475_v23 = vld [vmem:[#allocation2 + $0x140] sm:$0xf]  ;;  %v1871_v25 = vld [vmem:[#allocation2 + $0x144] sm:$0xf]  ;;  %v1828_v39 = vld [vmem:[%s2109_s1 + $0x18] sm:$0xff] }
  0x12   :  { %125 = vmatpush.bf16.msra.mxu0 %v122_v11  ;;  %567 = vmatpush.bf16.msra.mxu3 %v1548_v13  ;;  %v1875_v24 = vld [vmem:[#allocation2 + $0x15c] sm:$0xf0]  ;;  %v1477_v26 = vld [vmem:[#allocation2 + $0x160] sm:$0xf0]  ;;  %v1483_v27 = vld [vmem:[#allocation2 + $0x148] sm:$0xf] }
  0x13   :  { %v1829_v28 = vld [vmem:[%s2109_s1 + $0x20] sm:$0xff]  ;;  %v1476_v29 = vor.u32 %v1875_v24, %v1475_v23  ;;  %v1876_v30 = vld [vmem:[#allocation2 + $0x164] sm:$0xf0]  ;;  %v1480_v31 = vor.u32 %v1871_v25, %v1477_v26  ;;  %v1827_v49 = vld [vmem:[%s2109_s1 + $0x10] sm:$0xff]  ;;  %vm116_vm1 = vcmask 818176  }
  0x14   :  { %v1484_v32 = vor.u32 %v1876_v30, %v1483_v27  ;;  %v1443_v33 = vld [vmem:[#allocation2 + $0x100] sm:$0xf]  ;;  %v1863_v35 = vld [vmem:[#allocation2 + $0x104] sm:$0xf]  ;;  %v1451_v37 = vld [vmem:[#allocation2 + $0x108] sm:$0xf] }
  0x15   :  { %542 = vmatpush.bf16.msra.mxu1 %v1508_v18  ;;  %555 = vmatpush.bf16.msra.mxu2 %v1512_v19  ;;  %v1867_v34 = vld [vmem:[#allocation2 + $0x11c] sm:$0xf0]  ;;  %v1445_v36 = vld [vmem:[#allocation2 + $0x120] sm:$0xf0]  ;;  %v1868_v38 = vld [vmem:[#allocation2 + $0x124] sm:$0xf0] }
  0x16   :  { %126 = vmatpush.bf16.msra.mxu0 %v1830_v12  ;;  %568 = vmatpush.bf16.msra.mxu3 %v1516_v22  ;;  %v1444_v40 = vor.u32 %v1867_v34, %v1443_v33  ;;  %v1448_v41 = vor.u32 %v1863_v35, %v1445_v36  ;;  %v1452_v42 = vor.u32 %v1868_v38, %v1451_v37  ;;  %v1411_v43 = vld [vmem:[#allocation2 + $0xc0] sm:$0xf]  ;;  %v1855_v45 = vld [vmem:[#allocation2 + $0xc4] sm:$0xf]  ;;  %v1419_v47 = vld [vmem:[#allocation2 + $0xc8] sm:$0xf] }
  0x17   :  { %v1859_v44 = vld [vmem:[#allocation2 + $0xdc] sm:$0xf0]  ;;  %v1413_v46 = vld [vmem:[#allocation2 + $0xe0] sm:$0xf0]  ;;  %v1860_v48 = vld [vmem:[#allocation2 + $0xe4] sm:$0xf0] }
  0x18   :  { %v1412_v50 = vor.u32 %v1859_v44, %v1411_v43  ;;  %v1416_v51 = vor.u32 %v1855_v45, %v1413_v46  ;;  %v1420_v52 = vor.u32 %v1860_v48, %v1419_v47  ;;  %v1379_v53 = vld [vmem:[#allocation2 + $0x80] sm:$0xf]  ;;  %v1847_v55 = vld [vmem:[#allocation2 + $0x84] sm:$0xf]  ;;  %v1387_v57 = vld [vmem:[#allocation2 + $0x88] sm:$0xf] }
  0x19   :  { %543 = vmatpush.bf16.msra.mxu1 %v1476_v29  ;;  %556 = vmatpush.bf16.msra.mxu2 %v1480_v31  ;;  %v1851_v54 = vld [vmem:[#allocation2 + $0x9c] sm:$0xf0]  ;;  %v1381_v56 = vld [vmem:[#allocation2 + $0xa0] sm:$0xf0]  ;;  %v1852_v58 = vld [vmem:[#allocation2 + $0xa4] sm:$0xf0] }
  0x1a   :  { %127 = vmatpush.bf16.msra.mxu0 %v1829_v28  ;;  %569 = vmatpush.bf16.msra.mxu3 %v1484_v32  ;;  %v1826_v59 = vld [vmem:[%s2109_s1 + $0x8] sm:$0xff]  ;;  %v1380_v60 = vor.u32 %v1851_v54, %v1379_v53  ;;  %v1384_v62 = vor.u32 %v1847_v55, %v1381_v56  ;;  %v1388_v63 = vor.u32 %v1852_v58, %v1387_v57  ;;  %v1347_v0 = vld [vmem:[#allocation2 + $0x40] sm:$0xf]  ;;  %v1839_v3 = vld [vmem:[#allocation2 + $0x44] sm:$0xf] }
  0x1b   :  { %v1888_v61 = vld [vmem:[#allocation2 + $0x1cc] sm:$0xf]  ;;  %v1843_v1 = vld [vmem:[#allocation2 + $0x5c] sm:$0xf0]  ;;  %v1349_v4 = vld [vmem:[#allocation2 + $0x60] sm:$0xf0] }
  0x1c   :  { %v1549_v2 = vld [vmem:[#allocation2 + $0x1e8] sm:$0xf0]  ;;  %v1355_v5 = vld [vmem:[#allocation2 + $0x48] sm:$0xf]  ;;  %v1825_v7 = vld [vmem:[%s2109_s1] sm:$0xff]  ;;  %v1348_v10 = vor.u32 %v1843_v1, %v1347_v0  ;;  %v1352_v12 = vor.u32 %v1839_v3, %v1349_v4 }
  0x1d   :  { %544 = vmatpush.bf16.msra.mxu1 %v1444_v40  ;;  %557 = vmatpush.bf16.msra.mxu2 %v1448_v41  ;;  %v1844_v6 = vld [vmem:[#allocation2 + $0x64] sm:$0xf0]  ;;  %v1880_v8 = vld [vmem:[#allocation2 + $0x18c] sm:$0xf]  ;;  %v1552_v11 = vor.u32 %v1888_v61, %v1549_v2  ;;  %v1315_v13 = vld [vmem:[#allocation2] sm:$0xf] }
  0x1e   :  { %128 = vmatpush.bf16.msra.mxu0 %v1828_v39  ;;  %570 = vmatpush.bf16.msra.mxu3 %v1452_v42  ;;  %v1517_v9 = vld [vmem:[#allocation2 + $0x1a8] sm:$0xf0]  ;;  %v1835_v14 = vld [vmem:[#allocation2 + $0x1c] sm:$0xf0]  ;;  %v1831_v15 = vld [vmem:[#allocation2 + $0x4] sm:$0xf]  ;;  %v1356_v17 = vor.u32 %v1844_v6, %v1355_v5 }
  0x1f   :  { %v59_v16 = vld [vmem:[%s2108_s0] sm:$0xf]  ;;  %v1317_v18 = vld [vmem:[#allocation2 + $0x20] sm:$0xf0]  ;;  %v1323_v19 = vld [vmem:[#allocation2 + $0x8] sm:$0xf]  ;;  %v1316_v24 = vor.u32 %v1835_v14, %v1315_v13  ;;  %v1520_v28 = vor.u32 %v1880_v8, %v1517_v9 }
  0x20   :  { %v1836_v20 = vld [vmem:[#allocation2 + $0x24] sm:$0xf0]  ;;  %v1555_v21 = vld [vmem:[#allocation2 + $0x1d0] sm:$0xf]  ;;  %v1889_v23 = vld [vmem:[#allocation2 + $0x1d4] sm:$0xf]  ;;  %v1320_v29 = vor.u32 %v1831_v15, %v1317_v18 }
  0x21   :  { %545 = vmatpush.bf16.msra.mxu1 %v1412_v50  ;;  %558 = vmatpush.bf16.msra.mxu2 %v1416_v51  ;;  %v1893_v22 = vld [vmem:[#allocation2 + $0x1ec] sm:$0xf0]  ;;  %v1557_v25 = vld [vmem:[#allocation2 + $0x1f0] sm:$0xf0]  ;;  %v1563_v26 = vld [vmem:[#allocation2 + $0x1d8] sm:$0xf]  ;;  %v1324_v32 = vor.u32 %v1836_v20, %v1323_v19 }
  0x22   :  { %129 = vmatpush.bf16.msra.mxu0 %v1827_v49  ;;  %571 = vmatpush.bf16.msra.mxu3 %v1420_v52  ;;  %v1894_v27 = vld [vmem:[#allocation2 + $0x1f4] sm:$0xf0]  ;;  %v1872_v30 = vld [vmem:[#allocation2 + $0x14c] sm:$0xf]  ;;  %v1556_v33 = vor.u32 %v1893_v22, %v1555_v21  ;;  %v1560_v34 = vor.u32 %v1889_v23, %v1557_v25  ;;  %v1523_v36 = vld [vmem:[#allocation2 + $0x190] sm:$0xf] }
  0x23   :  { %v1485_v31 = vld [vmem:[#allocation2 + $0x168] sm:$0xf0]  ;;  %v1564_v35 = vor.u32 %v1894_v27, %v1563_v26  ;;  %v1885_v37 = vld [vmem:[#allocation2 + $0x1ac] sm:$0xf0]  ;;  %v1881_v38 = vld [vmem:[#allocation2 + $0x194] sm:$0xf] }
  0x24   :  { %v1525_v39 = vld [vmem:[#allocation2 + $0x1b0] sm:$0xf0]  ;;  %v1531_v40 = vld [vmem:[#allocation2 + $0x198] sm:$0xf]  ;;  %v1488_v42 = vor.u32 %v1872_v30, %v1485_v31  ;;  %v1864_v43 = vld [vmem:[#allocation2 + $0x10c] sm:$0xf]  ;;  %v1524_v45 = vor.u32 %v1885_v37, %v1523_v36 }
  0x25   :  { %546 = vmatpush.bf16.msra.mxu1 %v1380_v60  ;;  %559 = vmatpush.bf16.msra.mxu2 %v1384_v62  ;;  %v1886_v41 = vld [vmem:[#allocation2 + $0x1b4] sm:$0xf0]  ;;  %v1453_v44 = vld [vmem:[#allocation2 + $0x128] sm:$0xf0]  ;;  %v1528_v46 = vor.u32 %v1881_v38, %v1525_v39  ;;  %v1890_v60 = vld [vmem:[#allocation2 + $0x1dc] sm:$0xf] }
  0x26   :  { %130 = vmatpush.bf16.msra.mxu0 %v1826_v59  ;;  %572 = vmatpush.bf16.msra.mxu3 %v1388_v63  ;;  %v1532_v47 = vor.u32 %v1886_v41, %v1531_v40  ;;  %v1456_v48 = vor.u32 %v1864_v43, %v1453_v44  ;;  %v1856_v49 = vld [vmem:[#allocation2 + $0xcc] sm:$0xf]  ;;  %v1565_v61 = vld [vmem:[#allocation2 + $0x1f8] sm:$0xf0]  ;;  %v1491_v3 = vld [vmem:[#allocation2 + $0x150] sm:$0xf] }
  0x27   :  { %v1421_v50 = vld [vmem:[#allocation2 + $0xe8] sm:$0xf0]  ;;  %v1568_v63 = vor.u32 %v1890_v60, %v1565_v61  ;;  %v1882_v0 = vld [vmem:[#allocation2 + $0x19c] sm:$0xf]  ;;  %v1877_v4 = vld [vmem:[#allocation2 + $0x16c] sm:$0xf0] }
  0x28   :  { %v1424_v51 = vor.u32 %v1856_v49, %v1421_v50  ;;  %v1848_v52 = vld [vmem:[#allocation2 + $0x8c] sm:$0xf]  ;;  %v1533_v1 = vld [vmem:[#allocation2 + $0x1b8] sm:$0xf0]  ;;  %v1873_v5 = vld [vmem:[#allocation2 + $0x154] sm:$0xf]  ;;  %v1492_v6 = vor.u32 %v1877_v4, %v1491_v3 }
  0x29   :  { %547 = vmatpush.bf16.msra.mxu1 %v1348_v10  ;;  %560 = vmatpush.bf16.msra.mxu2 %v1352_v12  ;;  %v1389_v53 = vld [vmem:[#allocation2 + $0xa8] sm:$0xf0]  ;;  %v1536_v2 = vor.u32 %v1882_v0, %v1533_v1  ;;  %v1499_v8 = vld [vmem:[#allocation2 + $0x158] sm:$0xf]  ;;  %v1874_v12 = vld [vmem:[#allocation2 + $0x15c] sm:$0xf] }
  0x2a   :  { %131 = vmatpush.bf16.msra.mxu0 %v1825_v7  ;;  %573 = vmatpush.bf16.msra.mxu3 %v1356_v17  ;;  %v1392_v54 = vor.u32 %v1848_v52, %v1389_v53  ;;  %v1840_v55 = vld [vmem:[#allocation2 + $0x4c] sm:$0xf]  ;;  %v1493_v7 = vld [vmem:[#allocation2 + $0x170] sm:$0xf0]  ;;  %v1878_v9 = vld [vmem:[#allocation2 + $0x174] sm:$0xf0] }
  0x2b   :  { %v1357_v56 = vld [vmem:[#allocation2 + $0x68] sm:$0xf0]  ;;  %v1496_v10 = vor.u32 %v1873_v5, %v1493_v7  ;;  %v1501_v13 = vld [vmem:[#allocation2 + $0x178] sm:$0xf0]  ;;  %v1459_v15 = vld [vmem:[#allocation2 + $0x110] sm:$0xf] }
  0x2c   :  { %v1360_v57 = vor.u32 %v1840_v55, %v1357_v56  ;;  %v1832_v58 = vld [vmem:[#allocation2 + $0xc] sm:$0xf]  ;;  %v1504_v14 = vor.u32 %v1874_v12, %v1501_v13  ;;  %v1865_v17 = vld [vmem:[#allocation2 + $0x114] sm:$0xf]  ;;  %v1467_v20 = vld [vmem:[#allocation2 + $0x118] sm:$0xf] }
  0x2d   :  { %1312 = vmatmul.msk.bf16.vlgmr.msra.gmra.mxu0 %vm116_vm1, %v59_v16  ;;  %548 = vmatpush.bf16.msra.mxu1 %v1316_v24  ;;  %v1325_v59 = vld [vmem:[#allocation2 + $0x28] sm:$0xf0]  ;;  %v1869_v16 = vld [vmem:[#allocation2 + $0x12c] sm:$0xf0]  ;;  %v1461_v19 = vld [vmem:[#allocation2 + $0x130] sm:$0xf0] }
  0x2e   :  { %580 = vmatpush.bf16.msrb.mxu0 %v1552_v11  ;;  %561 = vmatpush.bf16.msra.mxu2 %v1320_v29  ;;  %v1328_v62 = vor.u32 %v1832_v58, %v1325_v59  ;;  %v1500_v11 = vor.u32 %v1878_v9, %v1499_v8  ;;  %v1460_v18 = vor.u32 %v1869_v16, %v1459_v15  ;;  %v1870_v21 = vld [vmem:[#allocation2 + $0x134] sm:$0xf0]  ;;  %v1866_v24 = vld [vmem:[#allocation2 + $0x11c] sm:$0xf]  ;;  %v1427_v27 = vld [vmem:[#allocation2 + $0xd0] sm:$0xf] }
  0x2f   :  { %574 = vmatpush.bf16.msra.mxu3 %v1324_v32  ;;  %v1464_v22 = vor.u32 %v1865_v17, %v1461_v19  ;;  %v1468_v23 = vor.u32 %v1870_v21, %v1467_v20  ;;  %v1469_v25 = vld [vmem:[#allocation2 + $0x138] sm:$0xf0]  ;;  %v1857_v29 = vld [vmem:[#allocation2 + $0xd4] sm:$0xf]  ;;  %v1435_v32 = vld [vmem:[#allocation2 + $0xd8] sm:$0xf] }
  0x30   :  { %v1472_v26 = vor.u32 %v1866_v24, %v1469_v25  ;;  %v1429_v31 = vld [vmem:[#allocation2 + $0xf0] sm:$0xf0]  ;;  %v1858_v36 = vld [vmem:[#allocation2 + $0xdc] sm:$0xf]  ;;  %v1395_v38 = vld [vmem:[#allocation2 + $0x90] sm:$0xf] }
  0x31   :  { %593 = vmatpush.bf16.msrb.mxu1 %v1556_v33  ;;  %v1862_v33 = vld [vmem:[#allocation2 + $0xf4] sm:$0xf0]  ;;  %v1437_v37 = vld [vmem:[#allocation2 + $0xf8] sm:$0xf0]  ;;  %v1853_v40 = vld [vmem:[#allocation2 + $0xac] sm:$0xf0] }
  0x32   :  { %581 = vmatpush.bf16.msrb.mxu0 %v1520_v28  ;;  %606 = vmatpush.bf16.msrb.mxu2 %v1560_v34  ;;  %v1861_v28 = vld [vmem:[#allocation2 + $0xec] sm:$0xf0]  ;;  %v1432_v34 = vor.u32 %v1857_v29, %v1429_v31  ;;  %v1440_v39 = vor.u32 %v1858_v36, %v1437_v37  ;;  %v1849_v41 = vld [vmem:[#allocation2 + $0x94] sm:$0xf]  ;;  %v1396_v43 = vor.u32 %v1853_v40, %v1395_v38  ;;  %v1405_v49 = vld [vmem:[#allocation2 + $0xb8] sm:$0xf0] }
  0x33   :  { %619 = vmatpush.bf16.msrb.mxu3 %v1564_v35  ;;  %v1428_v30 = vor.u32 %v1861_v28, %v1427_v27  ;;  %v1436_v35 = vor.u32 %v1862_v33, %v1435_v32  ;;  %v1363_v50 = vld [vmem:[#allocation2 + $0x50] sm:$0xf]  ;;  %v1841_v53 = vld [vmem:[#allocation2 + $0x54] sm:$0xf]  ;;  %v1371_v55 = vld [vmem:[#allocation2 + $0x58] sm:$0xf] }
  0x34   :  { %v1842_v58 = vld [vmem:[#allocation2 + $0x5c] sm:$0xf]  ;;  %v1833_v0 = vld [vmem:[#allocation2 + $0x14] sm:$0xf]  ;;  %v1339_v3 = vld [vmem:[#allocation2 + $0x18] sm:$0xf] }
  0x35   :  { %594 = vmatpush.bf16.msrb.mxu1 %v1524_v45  ;;  %v1403_v45 = vld [vmem:[#allocation2 + $0x98] sm:$0xf]  ;;  %v1373_v59 = vld [vmem:[#allocation2 + $0x78] sm:$0xf0]  ;;  %v1901_v21 = vld [vmem:[#allocation4 + $0x30] sm:$0xff] }
  0x36   :  { %582 = vmatpush.bf16.msrb.mxu0 %v1488_v42  ;;  %607 = vmatpush.bf16.msrb.mxu2 %v1528_v46  ;;  %v1397_v42 = vld [vmem:[#allocation2 + $0xb0] sm:$0xf0]  ;;  %v1854_v46 = vld [vmem:[#allocation2 + $0xb4] sm:$0xf0]  ;;  %v1376_v1 = vor.u32 %v1842_v58, %v1373_v59  ;;  %v1834_v5 = vld [vmem:[#allocation2 + $0x1c] sm:$0xf] }
  0x37   :  { %620 = vmatpush.bf16.msrb.mxu3 %v1532_v47  ;;  %v1400_v44 = vor.u32 %v1849_v41, %v1397_v42  ;;  %v1850_v47 = vld [vmem:[#allocation2 + $0x9c] sm:$0xf]  ;;  %v1838_v4 = vld [vmem:[#allocation2 + $0x34] sm:$0xf0]  ;;  %v1917_v24 = vld [vmem:[#allocation4 + $0xb0] sm:$0xff] }
  0x38   :  { %v1408_v52 = vor.u32 %v1850_v47, %v1405_v49  ;;  %v1340_v9 = vor.u32 %v1838_v4, %v1339_v3  ;;  %v1902_v16 = vld [vmem:[#allocation4 + $0x38] sm:$0xff]  ;;  %v1900_v25 = vld [vmem:[#allocation4 + $0x28] sm:$0xff]  ;;  %v1899_v29 = vld [vmem:[#allocation4 + $0x20] sm:$0xff] }
  0x39   :  { %595 = vmatpush.bf16.msrb.mxu1 %v1492_v6  ;;  %v1341_v6 = vld [vmem:[#allocation2 + $0x38] sm:$0xf0]  ;;  %v1908_v27 = vld [vmem:[#allocation4 + $0x68] sm:$0xff]  ;;  %v1907_v31 = vld [vmem:[#allocation4 + $0x60] sm:$0xff] }
  0x3a   :  { %583 = vmatpush.bf16.msrb.mxu0 %v1456_v48  ;;  %608 = vmatpush.bf16.msrb.mxu2 %v1496_v10  ;;  %v1404_v48 = vor.u32 %v1854_v46, %v1403_v45  ;;  %v1344_v10 = vor.u32 %v1834_v5, %v1341_v6  ;;  %v1926_v17 = vld [vmem:[#allocation4 + $0xf8] sm:$0xff]  ;;  %v1916_v28 = vld [vmem:[#allocation4 + $0xa8] sm:$0xff]  ;;  %v1915_v32 = vld [vmem:[#allocation4 + $0xa0] sm:$0xff] }
  0x3b   :  { %621 = vmatpush.bf16.msrb.mxu3 %v1500_v11  ;;  %v1965_v11 = vld [vmem:[%s2110_s2] ss:$0 sm:$0xff]  ;;  %v1918_v19 = vld [vmem:[#allocation4 + $0xb8] sm:$0xff]  ;;  %v1897_v37 = vld [vmem:[#allocation4 + $0x10] sm:$0xff] }
  0x3c   :  { %v1898_v33 = vld [vmem:[#allocation4 + $0x18] sm:$0xff]  ;;  %v1921_v38 = vld [vmem:[#allocation4 + $0xd0] sm:$0xff]  ;;  %v1896_v41 = vld [vmem:[#allocation4 + $0x8] sm:$0xff] }
  0x3d   :  { %596 = vmatpush.bf16.msrb.mxu1 %v1460_v18  ;;  %v1910_v18 = vld [vmem:[#allocation4 + $0x78] sm:$0xff]  ;;  %v1913_v40 = vld [vmem:[#allocation4 + $0x90] sm:$0xff]  ;;  %v1920_v42 = vld [vmem:[#allocation4 + $0xc8] sm:$0xff] }
  0x3e   :  { %584 = vmatpush.bf16.msrb.mxu0 %v1424_v51  ;;  %609 = vmatpush.bf16.msrb.mxu2 %v1464_v22  ;;  %v1845_v51 = vld [vmem:[#allocation2 + $0x6c] sm:$0xf0]  ;;  %v1914_v36 = vld [vmem:[#allocation4 + $0x98] sm:$0xff]  ;;  %v1895_v45 = vld [vmem:[#allocation4] sm:$0xff] }
  0x3f   :  { %622 = vmatpush.bf16.msrb.mxu3 %v1468_v23  ;;  %v1364_v56 = vor.u32 %v1845_v51, %v1363_v50  ;;  %v1925_v22 = vld [vmem:[#allocation4 + $0xf0] sm:$0xff]  ;;  %v1919_v46 = vld [vmem:[#allocation4 + $0xc0] sm:$0xff]  ;;  %v1934_v47 = vld [vmem:[#allocation4 + $0x138] sm:$0xff] }
  0x40   :  { %v1909_v23 = vld [vmem:[#allocation4 + $0x70] sm:$0xff]  ;;  %v1903_v49 = vld [vmem:[#allocation4 + $0x40] sm:$0xff]  ;;  %v1942_v51 = vld [vmem:[#allocation4 + $0x178] sm:$0xff] }
  0x41   :  { %597 = vmatpush.bf16.msrb.mxu1 %v1428_v30  ;;  %v1923_v30 = vld [vmem:[#allocation4 + $0xe0] sm:$0xff]  ;;  %v1949_v58 = vld [vmem:[#allocation4 + $0x1b0] sm:$0xff]  ;;  %v1938_v5 = vld [vmem:[#allocation4 + $0x158] sm:$0xff] }
  0x42   :  { %585 = vmatpush.bf16.msrb.mxu0 %v1392_v54  ;;  %610 = vmatpush.bf16.msrb.mxu2 %v1432_v34  ;;  %v1365_v54 = vld [vmem:[#allocation2 + $0x70] sm:$0xf0]  ;;  %v1922_v34 = vld [vmem:[#allocation4 + $0xd8] sm:$0xff]  ;;  %v1911_v50 = vld [vmem:[#allocation4 + $0x80] sm:$0xff] }
  0x43   :  { %623 = vmatpush.bf16.msrb.mxu3 %v1436_v35  ;;  %v1368_v60 = vor.u32 %v1841_v53, %v1365_v54  ;;  %v1906_v35 = vld [vmem:[#allocation4 + $0x58] sm:$0xff]  ;;  %v1933_v53 = vld [vmem:[#allocation4 + $0x130] sm:$0xff]  ;;  %v1931_v59 = vld [vmem:[#allocation4 + $0x120] sm:$0xff] }
  0x44   :  { %v1957_v54 = vld [vmem:[#allocation4 + $0x1f0] sm:$0xff]  ;;  %v1946_v6 = vld [vmem:[#allocation4 + $0x198] sm:$0xff] }
  0x45   :  { %598 = vmatpush.bf16.msrb.mxu1 %v1396_v43  ;;  %v1904_v43 = vld [vmem:[#allocation4 + $0x48] sm:$0xff]  ;;  %v1929_v3 = vld [vmem:[#allocation4 + $0x110] sm:$0xff] }
  0x46   :  { %586 = vmatpush.bf16.msrb.mxu0 %v1360_v57  ;;  %v1846_v57 = vld [vmem:[#allocation2 + $0x74] sm:$0xf0]  ;;  %611 = vmatpush.bf16.msrb.mxu2 %v1400_v44  ;;  %v1912_v44 = vld [vmem:[#allocation4 + $0x88] sm:$0xff]  ;;  %v1953_v4 = vld [vmem:[#allocation4 + $0x1d0] sm:$0xff] }
  0x47   :  { %624 = vmatpush.bf16.msrb.mxu3 %v1404_v48  ;;  %v1372_v61 = vor.u32 %v1846_v57, %v1371_v55  ;;  %v1958_v48 = vld [vmem:[#allocation4 + $0x1f8] sm:$0xff]  ;;  %v1932_v55 = vld [vmem:[#allocation4 + $0x128] sm:$0xff]  ;;  %v1941_v57 = vld [vmem:[#allocation4 + $0x170] sm:$0xff] }
  0x49   :  { %599 = vmatpush.bf16.msrb.mxu1 %v1364_v56  ;;  %v1956_v56 = vld [vmem:[#allocation4 + $0x1e8] sm:$0xff] }
  0x4a   :  { %587 = vmatpush.bf16.msrb.mxu0 %v1328_v62  ;;  %v1331_v62 = vld [vmem:[#allocation2 + $0x10] sm:$0xf]  ;;  %612 = vmatpush.bf16.msrb.mxu2 %v1368_v60  ;;  %v1955_v60 = vld [vmem:[#allocation4 + $0x1e0] sm:$0xff] }
  0x4b   :  { %625 = vmatpush.bf16.msrb.mxu3 %v1372_v61  ;;  %v1940_v61 = vld [vmem:[#allocation4 + $0x168] sm:$0xff] }
  0x4e   :  { %632 = vmatpush.bf16.msra.mxu0 %v1568_v63  ;;  %v1837_v63 = vld [vmem:[#allocation2 + $0x2c] sm:$0xf0] }
  0x4f   :  { %v1332_v7 = vor.u32 %v1837_v63, %v1331_v62  ;;  %626 = vmatpush.bf16.msrb.mxu3 %v1340_v9  ;;  %v1948_v62 = vld [vmem:[#allocation4 + $0x1a8] sm:$0xff]  ;;  %v1930_v63 = vld [vmem:[#allocation4 + $0x118] sm:$0xff]  ;;  %v1937_v9 = vld [vmem:[#allocation4 + $0x150] sm:$0xff] }
  0x51   :  { %600 = vmatpush.bf16.msrb.mxu1 %v1332_v7  ;;  %v1928_v7 = vld [vmem:[#allocation4 + $0x108] sm:$0xff] }
  0x52   :  { %633 = vmatpush.bf16.msra.mxu0 %v1536_v2  ;;  %v1333_v2 = vld [vmem:[#allocation2 + $0x30] sm:$0xf0] }
  0x53   :  { %v1336_v8 = vor.u32 %v1833_v0, %v1333_v2  ;;  %v1954_v0 = vld [vmem:[#allocation4 + $0x1d8] sm:$0xff]  ;;  %v1947_v2 = vld [vmem:[#allocation4 + $0x1a0] sm:$0xff] }
  0x55   :  { %613 = vmatpush.bf16.msrb.mxu2 %v1336_v8  ;;  %v1952_v8 = vld [vmem:[#allocation4 + $0x1c8] sm:$0xff] }
  0x56   :  { %634 = vmatpush.bf16.msra.mxu0 %v1504_v14 }
  0x5a   :  { %635 = vmatpush.bf16.msra.mxu0 %v1472_v26  ;;  %v1924_v26 = vld [vmem:[#allocation4 + $0xe8] sm:$0xff] }
  0x5e   :  { %636 = vmatpush.bf16.msra.mxu0 %v1440_v39  ;;  %v1905_v39 = vld [vmem:[#allocation4 + $0x50] sm:$0xff] }
  0x62   :  { %637 = vmatpush.bf16.msra.mxu0 %v1408_v52  ;;  %v1950_v52 = vld [vmem:[#allocation4 + $0x1b8] sm:$0xff] }
  0x66   :  { %638 = vmatpush.bf16.msra.mxu0 %v1376_v1  ;;  %v1939_v1 = vld [vmem:[#allocation4 + $0x160] sm:$0xff] }
  0x6a   :  { %639 = vmatpush.bf16.msra.mxu0 %v1344_v10  ;;  %v1945_v10 = vld [vmem:[#allocation4 + $0x190] sm:$0xff] }
  0xaa   :  { %v133_v12 = vpop.f32.mrf.mxu0 }
  0xab   :  { %v134_v13 = vadd.f32 %v1965_v11, %v133_v12  ;;  %v1927_v11 = vld [vmem:[#allocation4 + $0x100] sm:$0xff] }
  0xac   :  { %v1951_v12 = vld [vmem:[#allocation4 + $0x1c0] sm:$0xff] }
  0xad   :  { %v137_v14 = vmax.f32 %v134_v13, 0.0  ;;  %v1936_v13 = vld [vmem:[#allocation4 + $0x148] sm:$0xff] }
  0xaf   :  { %v138_v15 = vpack.c.bf16 %v137_v14, %v137_v14  ;;  %v1944_v14 = vld [vmem:[#allocation4 + $0x188] sm:$0xff] }
  0xb1   :  { %549 = vmatmul.bf16.vlgmr.msra.gmra.mxu1 %v138_v15  ;;  %562 = vmatmul.bf16.vlgmr.msra.gmra.mxu2 %v138_v15 }
  0xb2   :  { %575 = vmatmul.bf16.vlgmr.msra.gmra.mxu3 %v138_v15  ;;  %588 = vmatmul.bf16.vlgmr.msrb.gmra.mxu0 %v138_v15  ;;  %v135_v20 = vpop.f32.mrf.mxu0 }
  0xb3   :  { %1177 = vmatpush.bf16.msra.mxu1 %v1902_v16  ;;  %1216 = vmatpush.bf16.msrb.mxu0 %v1926_v17  ;;  %v1943_v16 = vld [vmem:[#allocation4 + $0x180] sm:$0xff] }
  0xb4   :  { %1190 = vmatpush.bf16.msra.mxu2 %v1910_v18  ;;  %1203 = vmatpush.bf16.msra.mxu3 %v1918_v19  ;;  %v203_v17 = vld [vmem:[%s2112_s4] sm:$0xff] }
  0xb5   :  { %v205_v18 = vperm.slane %v203_v17, 0  ;;  %v208_v19 = vperm.slane %v203_v17, 3 }
  0xb7   :  { %1178 = vmatpush.bf16.msra.mxu1 %v1901_v21  ;;  %1217 = vmatpush.bf16.msrb.mxu0 %v1925_v22 }
  0xb8   :  { %1191 = vmatpush.bf16.msra.mxu2 %v1909_v23  ;;  %1204 = vmatpush.bf16.msra.mxu3 %v1917_v24 }
  0xbb   :  { %1179 = vmatpush.bf16.msra.mxu1 %v1900_v25  ;;  %1218 = vmatpush.bf16.msrb.mxu0 %v1924_v26  ;;  %v206_v25 = vperm.slane %v203_v17, 1 }
  0xbc   :  { %1192 = vmatpush.bf16.msra.mxu2 %v1908_v27  ;;  %1205 = vmatpush.bf16.msra.mxu3 %v1916_v28  ;;  %v207_v27 = vperm.slane %v203_v17, 2 }
  0xbf   :  { %1180 = vmatpush.bf16.msra.mxu1 %v1899_v29  ;;  %1219 = vmatpush.bf16.msrb.mxu0 %v1923_v30 }
  0xc0   :  { %1193 = vmatpush.bf16.msra.mxu2 %v1907_v31  ;;  %1206 = vmatpush.bf16.msra.mxu3 %v1915_v32 }
  0xc1   :  { %601 = vmatmul.bf16.vlgmr.msrb.gmra.mxu1 %v138_v15  ;;  %614 = vmatmul.bf16.vlgmr.msrb.gmra.mxu2 %v138_v15 }
  0xc2   :  { %627 = vmatmul.bf16.vlgmr.msrb.gmra.mxu3 %v138_v15  ;;  %640 = vmatmul.bf16.vlgmr.msra.gmra.mxu0 %v138_v15  ;;  %v1935_v15 = vld [vmem:[#allocation4 + $0x140] sm:$0xff] }
  0xc3   :  { %1181 = vmatpush.bf16.msra.mxu1 %v1898_v33  ;;  %1220 = vmatpush.bf16.msrb.mxu0 %v1922_v34 }
  0xc4   :  { %1194 = vmatpush.bf16.msra.mxu2 %v1906_v35  ;;  %1207 = vmatpush.bf16.msra.mxu3 %v1914_v36 }
  0xc7   :  { %1182 = vmatpush.bf16.msra.mxu1 %v1897_v37  ;;  %1221 = vmatpush.bf16.msrb.mxu0 %v1921_v38 }
  0xc8   :  { %1195 = vmatpush.bf16.msra.mxu2 %v1905_v39  ;;  %1208 = vmatpush.bf16.msra.mxu3 %v1913_v40  ;;  %v209_v40 = vperm.slane %v203_v17, 4 }
  0xcb   :  { %1183 = vmatpush.bf16.msra.mxu1 %v1896_v41  ;;  %1222 = vmatpush.bf16.msrb.mxu0 %v1920_v42  ;;  %v212_v42 = vperm.slane %v203_v17, 7 }
  0xcc   :  { %1196 = vmatpush.bf16.msra.mxu2 %v1904_v43  ;;  %1209 = vmatpush.bf16.msra.mxu3 %v1912_v44 }
  0xcf   :  { %1184 = vmatpush.bf16.msra.mxu1 %v1895_v45  ;;  %1223 = vmatpush.bf16.msrb.mxu0 %v1919_v46 }
  0xd0   :  { %1197 = vmatpush.bf16.msra.mxu2 %v1903_v49  ;;  %1210 = vmatpush.bf16.msra.mxu3 %v1911_v50  ;;  %v210_v49 = vperm.slane %v203_v17, 5 }
  0xd3   :  { %1229 = vmatpush.bf16.msrb.mxu1 %v1934_v47  ;;  %1268 = vmatpush.bf16.msra.mxu0 %v1958_v48 }
  0xd4   :  { %1242 = vmatpush.bf16.msrb.mxu2 %v1942_v51  ;;  %1255 = vmatpush.bf16.msrb.mxu3 %v1950_v52  ;;  %v211_v51 = vperm.slane %v203_v17, 6 }
  0xd7   :  { %1230 = vmatpush.bf16.msrb.mxu1 %v1933_v53  ;;  %1269 = vmatpush.bf16.msra.mxu0 %v1957_v54 }
  0xd8   :  { %1243 = vmatpush.bf16.msrb.mxu2 %v1941_v57  ;;  %1256 = vmatpush.bf16.msrb.mxu3 %v1949_v58 }
  0xdb   :  { %1231 = vmatpush.bf16.msrb.mxu1 %v1932_v55  ;;  %1270 = vmatpush.bf16.msra.mxu0 %v1956_v56 }
  0xdc   :  { %1244 = vmatpush.bf16.msrb.mxu2 %v1940_v61  ;;  %1257 = vmatpush.bf16.msrb.mxu3 %v1948_v62 }
  0xdf   :  { %1232 = vmatpush.bf16.msrb.mxu1 %v1931_v59  ;;  %1271 = vmatpush.bf16.msra.mxu0 %v1955_v60 }
  0xe0   :  { %1245 = vmatpush.bf16.msrb.mxu2 %v1939_v1  ;;  %1258 = vmatpush.bf16.msrb.mxu3 %v1947_v2 }
  0xe3   :  { %1233 = vmatpush.bf16.msrb.mxu1 %v1930_v63  ;;  %1272 = vmatpush.bf16.msra.mxu0 %v1954_v0 }
  0xe4   :  { %1246 = vmatpush.bf16.msrb.mxu2 %v1938_v5  ;;  %1259 = vmatpush.bf16.msrb.mxu3 %v1946_v6  ;;  %v1966_v5 = vld [vmem:[%s2114_s6] ss:$0 sm:$0xff] }
  0xe7   :  { %1234 = vmatpush.bf16.msrb.mxu1 %v1929_v3  ;;  %1273 = vmatpush.bf16.msra.mxu0 %v1953_v4 }
  0xe8   :  { %1247 = vmatpush.bf16.msrb.mxu2 %v1937_v9  ;;  %1260 = vmatpush.bf16.msrb.mxu3 %v1945_v10 }
  0xeb   :  { %1235 = vmatpush.bf16.msrb.mxu1 %v1928_v7  ;;  %1274 = vmatpush.bf16.msra.mxu0 %v1952_v8 }
  0xec   :  { %1248 = vmatpush.bf16.msrb.mxu2 %v1936_v13  ;;  %1261 = vmatpush.bf16.msrb.mxu3 %v1944_v14 }
  0xef   :  { %1236 = vmatpush.bf16.msrb.mxu1 %v1927_v11  ;;  %1275 = vmatpush.bf16.msra.mxu0 %v1951_v12 }
  0xf0   :  { %1249 = vmatpush.bf16.msrb.mxu2 %v1935_v15  ;;  %1262 = vmatpush.bf16.msrb.mxu3 %v1943_v16 }
 0x12e   :  { %v550_v20 = vpop.f32.mrf.mxu1 }
 0x12f   :  { %v551_v21 = vadd.f32 %v550_v20, %v205_v18  ;;  %v589_v22 = vpop.f32.mrf.mxu0 }
 0x130   :  { %v590_v23 = vadd.f32 %v589_v22, %v208_v19 }
 0x131   :  { %v645_v24 = vmax.f32 %v551_v21, 0.0 }
 0x132   :  { %v648_v26 = vmax.f32 %v590_v23, 0.0 }
 0x133   :  { %v653_v28 = vpack.c.bf16 %v645_v24, %v645_v24 }
 0x134   :  { %v656_v29 = vpack.c.bf16 %v648_v26, %v648_v26  ;;  %v563_v30 = vpop.f32.mrf.mxu2 }
 0x135   :  { %v564_v31 = vadd.f32 %v563_v30, %v206_v25  ;;  %v576_v32 = vpop.f32.mrf.mxu3  ;;  %1185 = vmatmul.bf16.vlgmr.msra.gmra.mxu1 %v653_v28 }
 0x136   :  { %v577_v33 = vadd.f32 %v576_v32, %v207_v27  ;;  %1224 = vmatmul.bf16.vlgmr.msrb.gmra.mxu0 %v656_v29  ;;  %v552_v34 = vpop.f32.mrf.mxu1 }
 0x137   :  { %v646_v35 = vmax.f32 %v564_v31, 0.0  ;;  %v591_v36 = vpop.f32.mrf.mxu0 }
 0x138   :  { %v647_v37 = vmax.f32 %v577_v33, 0.0 }
 0x139   :  { %v654_v38 = vpack.c.bf16 %v646_v35, %v646_v35 }
 0x13a   :  { %v655_v39 = vpack.c.bf16 %v647_v37, %v647_v37 }
 0x13b   :  { %1198 = vmatmul.bf16.vlgmr.msra.gmra.mxu2 %v654_v38 }
 0x13c   :  { %1211 = vmatmul.bf16.vlgmr.msra.gmra.mxu3 %v655_v39  ;;  %v565_v41 = vpop.f32.mrf.mxu2 }
 0x13d   :  { %v578_v43 = vpop.f32.mrf.mxu3 }
 0x13e   :  { %v602_v44 = vpop.f32.mrf.mxu1 }
 0x13f   :  { %v603_v45 = vadd.f32 %v602_v44, %v209_v40  ;;  %v641_v46 = vpop.f32.mrf.mxu0 }
 0x140   :  { %v642_v47 = vadd.f32 %v641_v46, %v212_v42 }
 0x141   :  { %v649_v48 = vmax.f32 %v603_v45, 0.0 }
 0x142   :  { %v652_v50 = vmax.f32 %v642_v47, 0.0 }
 0x143   :  { %v657_v52 = vpack.c.bf16 %v649_v48, %v649_v48 }
 0x144   :  { %v660_v53 = vpack.c.bf16 %v652_v50, %v652_v50  ;;  %v615_v54 = vpop.f32.mrf.mxu2 }
 0x145   :  { %v616_v55 = vadd.f32 %v615_v54, %v210_v49  ;;  %v628_v56 = vpop.f32.mrf.mxu3  ;;  %1237 = vmatmul.bf16.vlgmr.msrb.gmra.mxu1 %v657_v52 }
 0x146   :  { %v629_v57 = vadd.f32 %v628_v56, %v211_v51  ;;  %1276 = vmatmul.bf16.vlgmr.msra.gmra.mxu0 %v660_v53  ;;  %v604_v58 = vpop.f32.mrf.mxu1 }
 0x147   :  { %v650_v59 = vmax.f32 %v616_v55, 0.0  ;;  %v643_v60 = vpop.f32.mrf.mxu0 }
 0x148   :  { %v651_v61 = vmax.f32 %v629_v57, 0.0 }
 0x149   :  { %v658_v62 = vpack.c.bf16 %v650_v59, %v650_v59 }
 0x14a   :  { %v659_v63 = vpack.c.bf16 %v651_v61, %v651_v61 }
 0x14b   :  { %1250 = vmatmul.bf16.vlgmr.msrb.gmra.mxu2 %v658_v62 }
 0x14c   :  { %1263 = vmatmul.bf16.vlgmr.msrb.gmra.mxu3 %v659_v63  ;;  %v617_v0 = vpop.f32.mrf.mxu2 }
 0x14d   :  { %v630_v1 = vpop.f32.mrf.mxu3 }
 0x1b2   :  { %v1186_v2 = vpop.f32.mrf.mxu1 }
 0x1b3   :  { %v1225_v3 = vpop.f32.mrf.mxu0  ;;  %v1187_v8 = vadd.f32 %v1966_v5, %v1186_v2 }
 0x1ba   :  { %v1188_v4 = vpop.f32.mrf.mxu1 }
 0x1bb   :  { %v1227_v6 = vpop.f32.mrf.mxu0 }
 0x1be   :  { %v1199_v7 = vpop.f32.mrf.mxu2 }
 0x1bf   :  { %v1212_v9 = vpop.f32.mrf.mxu3  ;;  %v1200_v10 = vadd.f32 %v1199_v7, %v1187_v8 }
 0x1c1   :  { %v1213_v13 = vadd.f32 %v1212_v9, %v1200_v10 }
 0x1c2   :  { %v1238_v11 = vpop.f32.mrf.mxu1 }
 0x1c3   :  { %v1277_v12 = vpop.f32.mrf.mxu0  ;;  %v1226_v16 = vadd.f32 %v1225_v3, %v1213_v13 }
 0x1c5   :  { %v1239_v19 = vadd.f32 %v1238_v11, %v1226_v16 }
 0x1c6   :  { %v1201_v14 = vpop.f32.mrf.mxu2 }
 0x1c7   :  { %v1214_v15 = vpop.f32.mrf.mxu3 }
 0x1ca   :  { %v1240_v17 = vpop.f32.mrf.mxu1 }
 0x1cb   :  { %v1279_v18 = vpop.f32.mrf.mxu0 }
 0x1ce   :  { %v1251_v20 = vpop.f32.mrf.mxu2 }
 0x1cf   :  { %v1252_v21 = vadd.f32 %v1251_v20, %v1239_v19  ;;  %v1264_v22 = vpop.f32.mrf.mxu3 }
 0x1d1   :  { %v1265_v23 = vadd.f32 %v1264_v22, %v1252_v21 }
 0x1d3   :  { %v1278_v24 = vadd.f32 %v1277_v12, %v1265_v23 }
 0x1d5   :  { %1281 = vst [vmem:[%s2115_s7] sm:$0xff] %v1278_v24 }
 0x1d6   :  { %v1253_v25 = vpop.f32.mrf.mxu2 }
 0x1d7   :  { %v1266_v26 = vpop.f32.mrf.mxu3 }
 0x1d8   :  { %1286 = vsyncpa [#allocation3], 1 }
 0x1d9   :  { %1287 = vsyncpa [#allocation5], 1 }

</bundles_post_ra>
